<compile_context>
chip_gen: v5e
topology: v5e:2x2
jax: 0.10.0
libtpu: 0.0.40
codegen_flags: <defaults>
</compile_context>

<pallas_src>
import functools
import math
from math import gcd

import jax
import jax.numpy as jnp
from jax.experimental import pallas as pl
from jax.experimental.pallas import tpu as pltpu


def _round_up(a: int, b: int) -> int:
    return (a + b - 1) // b * b


def _cdiv(a: int, b: int) -> int:
    return -(-a // b)


def _pe_kernel(inv_ref, off_ref, par_ref, o_ref, *, pack: int, tile_rows: int):
    """One (tile_rows, packed_d) lane-dense slab of the PE table.

    Output row r, column c of grid step i corresponds to
      position = (i * tile_rows + r) * pack + c // d_model
      feature  = c % d_model
    inv_ref / off_ref / par_ref are per-column (1, packed_d) rows precomputed in the
    wrapper: inverse frequency, position offset within the packed row, and parity
    (0 -> sin column, 1 -> cos column).
    """
    i = pl.program_id(0)
    row = jax.lax.broadcasted_iota(jnp.int32, (tile_rows, 1), 0) + i * tile_rows
    pos = row.astype(jnp.float32)                     # exact for positions < 2^24
    if pack > 1:
        pos = pos * jnp.float32(pack) + off_ref[...]  # (tile_rows, packed_d)
    angle = pos * inv_ref[...]                        # same f32 product as reference
    cos_col = par_ref[...] > 0.5
    o_ref[...] = jnp.where(cos_col, jnp.cos(angle), jnp.sin(angle))


@functools.lru_cache(maxsize=None)
def _pe_table(seq_len: int, d_model: int, max_len: int) -> jax.Array:
    assert seq_len <= max_len, "sequence length exceeds max_len"
    assert d_model % 2 == 0, "d_model must be even (matches PyTorch module)"

    # Lane-dense packing: `pack` consecutive positions share one output row so the
    # last dim is a multiple of 128 (unmasked vst).  pack = lcm(d_model,128)/d_model.
    pack = 128 // gcd(d_model, 128)
    if pack > 16:
        pack = 1
    packed_d = d_model * pack

    rows = _cdiv(seq_len, pack)                       # exact output rows (no tile padding)

    # Row-tile: ~4 MiB blocks (plenty of scoped-VMEM headroom double-buffered on
    # v5e/v6e/v7x), multiple of 8, capped at 2048 rows, and at most half the work so
    # the "parallel" grid axis has >= 2 steps for v7x's second TensorCore.
    bytes_per_row = packed_d * 4
    tile = (4 * 1024 * 1024 // bytes_per_row) // 8 * 8
    tile = max(8, min(2048, tile))
    rows8 = _round_up(rows, 8)
    if rows8 > 8:
        tile = min(tile, _round_up(_cdiv(rows8, 2), 8))
    tile = min(tile, rows8)
    grid = (_cdiv(rows, tile),)

    # Per-column rows.  div_term uses the exact same f32 expression as the reference
    # (and the PyTorch __init__), so the sin/cos arguments are bit-identical.
    half = jnp.exp(
        jnp.arange(0, d_model, 2, dtype=jnp.float32) * (-math.log(10000.0) / d_model)
    )
    inv_freq_row = jnp.tile(jnp.repeat(half, 2), pack).reshape(1, packed_d)
    parity_row = jnp.tile(
        (jnp.arange(d_model, dtype=jnp.int32) % 2).astype(jnp.float32), pack
    ).reshape(1, packed_d)
    pos_off_row = jnp.repeat(
        jnp.arange(pack, dtype=jnp.float32), d_model
    ).reshape(1, packed_d)

    kernel = functools.partial(_pe_kernel, pack=pack, tile_rows=tile)

    n_elems = rows * packed_d
    cost = pl.CostEstimate(
        flops=40 * n_elems,            # sin + cos VPU range-reduction/polynomials
        transcendentals=0,             # exp is hoisted to the wrapper
        bytes_accessed=n_elems * 4 + 3 * packed_d * 4,
    )

    row_spec = pl.BlockSpec((1, packed_d), lambda i: (0, 0))
    out = pl.pallas_call(
        kernel,
        out_shape=jax.ShapeDtypeStruct((rows, packed_d), jnp.float32),
        grid_spec=pltpu.PrefetchScalarGridSpec(
            num_scalar_prefetch=0,
            grid=grid,
            in_specs=[row_spec, row_spec, row_spec],
            out_specs=pl.BlockSpec((tile, packed_d), lambda i: (i, 0)),
        ),
        compiler_params=pltpu.CompilerParams(dimension_semantics=("parallel",)),
        cost_estimate=cost,
    )(inv_freq_row, pos_off_row, parity_row)

    # Contiguous row-major reshape back to (positions, d_model) is free.
    pe = out.reshape(rows * pack, d_model)
    if rows * pack != seq_len:         # only for the pack>1 remainder case
        pe = pe[:seq_len]
    return pe


def positional_embedding(x: jax.Array, d_model: int, max_len: int = 5000) -> jax.Array:
    """Pallas equivalent of PositionalEmbedding.forward(x) -> pe[:x.shape[1], :]."""
    # TODO(synk): for best end-to-end perf, fuse this table generation into the
    # consumer kernel that adds it to the embeddings (avoids the HBM round-trip).
    return _pe_table(int(x.shape[1]), int(d_model), int(max_len))


def _reference_pe(seq_len: int, d_model: int) -> jnp.ndarray:
    # Pure-JAX reference mirroring the PyTorch __init__ math.
    position = jnp.arange(seq_len, dtype=jnp.float32)[:, None]
    div_term = jnp.exp(
        jnp.arange(0, d_model, 2, dtype=jnp.float32) * (-math.log(10000.0) / d_model)
    )
    pe = jnp.zeros((seq_len, d_model), dtype=jnp.float32)
    pe = pe.at[:, 0::2].set(jnp.sin(position * div_term))
    pe = pe.at[:, 1::2].set(jnp.cos(position * div_term))
    return pe


if __name__ == "__main__":
    key = jax.random.PRNGKey(0)
    k1, k2, k3 = jax.random.split(key, 3)

    # 1) Small shape matching the module's typical usage (packed lane-dense path).
    batch, seq, d_model = 2, 8, 32
    x = jax.random.normal(k1, (batch, seq, d_model), dtype=jnp.float32)
    out = jax.block_until_ready(positional_embedding(x, d_model=d_model, max_len=5000))
    ref = _reference_pe(seq, d_model)
    assert out.shape == (seq, d_model), out.shape
    assert out.dtype == jnp.float32, out.dtype
    assert jnp.allclose(out, ref, atol=2e-5, rtol=2e-5), "mismatch vs reference (packed)"

    # 2) Unpacked path, multi-block grid, exact-sized output (the previously failing case).
    batch2, seq2, d_model2 = 2, 640, 256
    x2 = jax.random.normal(k2, (batch2, seq2, d_model2), dtype=jnp.float32)
    out2 = jax.block_until_ready(positional_embedding(x2, d_model=d_model2, max_len=5000))
    ref2 = _reference_pe(seq2, d_model2)
    assert out2.shape == (seq2, d_model2), out2.shape
    assert jnp.allclose(out2, ref2, atol=2e-5, rtol=2e-5), "mismatch vs reference (tiled)"

    # 3) Non-divisor d_model (generalized packing) with a packed-remainder trim.
    batch3, seq3, d_model3 = 2, 101, 96
    x3 = jax.random.normal(k3, (batch3, seq3, d_model3), dtype=jnp.float32)
    out3 = jax.block_until_ready(positional_embedding(x3, d_model=d_model3, max_len=5000))
    ref3 = _reference_pe(seq3, d_model3)
    assert out3.shape == (seq3, d_model3), out3.shape
    assert jnp.allclose(out3, ref3, atol=2e-5, rtol=2e-5), "mismatch vs reference (d=96)"

    print("KERNEL_OK")
</pallas_src>

<mosaic_0001>
module attributes {stable_mosaic.version = 11 : i64} {
  func.func @_pe_kernel(%arg0: i32, %arg1: memref<1x128xf32, #tpu.memory_space<vmem>>, %arg2: memref<1x128xf32, #tpu.memory_space<vmem>>, %arg3: memref<1x128xf32, #tpu.memory_space<vmem>>, %arg4: memref<8x128xf32, #tpu.memory_space<vmem>>) attributes {dimension_semantics = [#tpu.dimension_semantics<parallel>], iteration_bounds = array<i64: 1>, scalar_prefetch = 0 : i64, scratch_operands = 0 : i64, tpu.core_type = #tpu.core_type<tc>, window_params = [{pipeline_mode = #tpu.pipeline_mode<synchronous>, transform_indices = @transform_0, window_bounds = array<i64: 1, 128>}, {pipeline_mode = #tpu.pipeline_mode<synchronous>, transform_indices = @transform_1, window_bounds = array<i64: 1, 128>}, {pipeline_mode = #tpu.pipeline_mode<synchronous>, transform_indices = @transform_2, window_bounds = array<i64: 1, 128>}, {transform_indices = @transform_3, window_bounds = array<i64: 8, 128>}]} {
    %0 = tpu.iota {dimensions = array<i32: 0>} : vector<8x1xi32>
    %c8_i32 = arith.constant 8 : i32
    %1 = arith.muli %arg0, %c8_i32 : i32
    %2 = vector.broadcast %1 : i32 to vector<8x1xi32>
    %3 = arith.addi %0, %2 : vector<8x1xi32>
    %4 = arith.sitofp %3 : vector<8x1xi32> to vector<8x1xf32>
    %cst = arith.constant 4.000000e+00 : f32
    %5 = vector.broadcast %cst : f32 to vector<8x1xf32>
    %6 = arith.mulf %4, %5 : vector<8x1xf32>
    %c0 = arith.constant 0 : index
    %c0_0 = arith.constant 0 : index
    %7 = vector.load %arg2[%c0, %c0_0] : memref<1x128xf32, #tpu.memory_space<vmem>>, vector<1x128xf32>
    %8 = vector.broadcast %6 : vector<8x1xf32> to vector<8x128xf32>
    %9 = vector.broadcast %7 : vector<1x128xf32> to vector<8x128xf32>
    %10 = arith.addf %8, %9 : vector<8x128xf32>
    %c0_1 = arith.constant 0 : index
    %c0_2 = arith.constant 0 : index
    %11 = vector.load %arg1[%c0_1, %c0_2] : memref<1x128xf32, #tpu.memory_space<vmem>>, vector<1x128xf32>
    %12 = vector.broadcast %11 : vector<1x128xf32> to vector<8x128xf32>
    %13 = arith.mulf %10, %12 : vector<8x128xf32>
    %c0_3 = arith.constant 0 : index
    %c0_4 = arith.constant 0 : index
    %14 = vector.load %arg3[%c0_3, %c0_4] : memref<1x128xf32, #tpu.memory_space<vmem>>, vector<1x128xf32>
    %cst_5 = arith.constant 5.000000e-01 : f32
    %15 = vector.broadcast %cst_5 : f32 to vector<1x128xf32>
    %16 = arith.cmpf ogt, %14, %15 : vector<1x128xf32>
    %17 = math.cos %13 : vector<8x128xf32>
    %18 = math.sin %13 : vector<8x128xf32>
    %19 = vector.shape_cast %16 : vector<1x128xi1> to vector<1x128xi1>
    %20 = vector.broadcast %19 : vector<1x128xi1> to vector<8x128xi1>
    %21 = arith.select %20, %17, %18 : vector<8x128xi1>, vector<8x128xf32>
    %c0_6 = arith.constant 0 : index
    %c0_7 = arith.constant 0 : index
    %22 = vector.load %arg4[%c0_6, %c0_7] : memref<8x128xf32, #tpu.memory_space<vmem>>, vector<8x128xf32>
    tpu.vector_store %arg4[%c0_6, %c0_7], %21 {strides = array<i32>} : memref<8x128xf32, #tpu.memory_space<vmem>>, vector<8x128xf32>,
    return
  }
  func.func @transform_0(%arg0: i32) -> (i32, i32) {
    %c0_i32 = arith.constant 0 : i32
    %c0_i32_0 = arith.constant 0 : i32
    %c0_i32_1 = arith.constant 0 : i32
    return %c0_i32, %c0_i32_0 : i32, i32
  }
  func.func @transform_1(%arg0: i32) -> (i32, i32) {
    %c0_i32 = arith.constant 0 : i32
    %c0_i32_0 = arith.constant 0 : i32
    %c0_i32_1 = arith.constant 0 : i32
    return %c0_i32, %c0_i32_0 : i32, i32
  }
  func.func @transform_2(%arg0: i32) -> (i32, i32) {
    %c0_i32 = arith.constant 0 : i32
    %c0_i32_0 = arith.constant 0 : i32
    %c0_i32_1 = arith.constant 0 : i32
    return %c0_i32, %c0_i32_0 : i32, i32
  }
  func.func @transform_3(%arg0: i32) -> (i32, i32) {
    %c0_i32 = arith.constant 0 : i32
    %c0_i32_0 = arith.constant 0 : i32
    return %arg0, %c0_i32 : i32, i32
  }
}

</mosaic_0001>

<bundles_post_ra>
// kernel: tpu_custom_call.1
= control target key start
LH: loop header
LB: loop body
LE: loop exit
PB: predicated region body
PF: predicated region fallthrough
CT: control target
= control target key end

     0   :  { %8 = vsyncpa [#allocation3], 0  ;;  %s589_s0 = inlined_call_operand.hbm [shape: f32[1,128], index: 0, kind: input, shape index: {}]   ;;  %s590_s1 = inlined_call_operand.hbm [shape: f32[1,128], index: 1, kind: input, shape index: {}]   ;;  %s591_s2 = inlined_call_operand.vmem [shape: f32[1,128], index: 2, kind: input, shape index: {}]   ;;  %s592_s3 = inlined_call_operand.hbm [shape: f32[2,128], index: 3, kind: output, shape index: {}]  }
   0x1   :  { %9 = vsyncpa [#allocation6], 0 }
   0x2   :  { %10 = vsyncpa [#allocation4], 0  ;;  %s16_s14 = sshll.u32 %s589_s0, 4  ;;  %s494_s15 = smov [#allocation2]   ;;  %s17_s14 = int_to_ptr.hbm [resolvable:$true] %s16_s14 }
   0x3   :  { %s18_s16 = sshll.u32 %s494_s15, 4  ;;  %s27_s19 = sshll.u32 %s590_s1, 4  ;;  %s19_s16 = int_to_ptr.vmem [resolvable:$true] %s18_s16  ;;  %s28_s19 = int_to_ptr.hbm [resolvable:$true] %s27_s19 }
   0x4   :  { %21 = dma.hbm_to_vmem [thread:$0]  %s17_s14, 16, %s19_s16, [#allocation3]  }
   0x5   :  { %s495_s20 = smov [#allocation5]  }
   0x6   :  { %s29_s21 = sshll.u32 %s495_s20, 4  ;;  %s30_s21 = int_to_ptr.vmem [resolvable:$true] %s29_s21 }
   0x7   :  { %32 = dma.hbm_to_vmem [thread:$0]  %s28_s19, 16, %s30_s21, [#allocation6]  }
   0x8   :  { %488 = dma.done.wait [#allocation3], 16  }
   0x9   :  { %489 = vsyncadd [#allocation3], 4294967280 }
   0xa   :  { %490 = dma.done.wait [#allocation6], 16  }
   0xb   :  { %491 = vsyncadd [#allocation6], 4294967280  ;;  %v43_v0 = vlaneseq  ;;  %v414_v4 = vld [vmem:[#allocation5] ss:$0 sm:$0xff]  ;;  %v415_v5 = vld [vmem:[#allocation2] ss:$0 sm:$0xff] }
   0xc   :  { %v496_v19 = vmov 683565275   ;;  %v497_v21 = vmov 2475754826   ;;  %v498_v23 = vmov 2131351028  }
   0xd   :  { %v44_v1 = vshrl.u32 %v43_v0, 7  ;;  %v499_v25 = vmov 2102212464   ;;  %v500_v27 = vmov 920167782  }
   0xe   :  { %v501_v33 = vmov 1326507024  }
   0xf   :  { %v48_v2 = vcvt.s32.f32 %v44_v1 }
  0x11   :  { %v49_v3 = vmul.f32 4.0, %v48_v2 }
  0x13   :  { %v54_v6 = vadd.f32 %v414_v4, %v49_v3 }
  0x15   :  { %v532_v7 = vmul.f32 %v415_v5, %v54_v6 }
  0x17   :  { %v65_v8 = vand.u32 2139095040, %v532_v7  ;;  %v62_v10 = vand.u32 2147483647, %v532_v7  ;;  %vm64_vm12 = vcmp.lt.s32.totalorder %v532_v7, 0 }
  0x19   :  { %v66_v9 = vshrl.u32 %v65_v8, 23  ;;  %v69_v13 = vand.u32 8388607, %v62_v10  ;;  %v502_v8 = vmov 0   ;;  %vm63_vm13 = vcmp.le.f32.partialorder %v62_v10, 0.7853982 }
  0x1b   :  { %v396_v11 = vadd.s32 4294967169, %v66_v9  ;;  %v70_v16 = vor.u32 8388608, %v69_v13 }
  0x1d   :  { %v72_v12 = vadd.s32 1, %v396_v11  ;;  %v541_v35 = vshll.u32 %v70_v16, 8 }
  0x1f   :  { %vm73_vm0 = vcmp.gt.s32.totalorder %v72_v12, 0  ;;  %v111_v47 = vand.u32 65535, %v541_v35  ;;  %v112_v48 = vshrl.u32 %v541_v35, 16 }
  0x20   :  { %v74_v14 = vsel %vm73_vm0, %v72_v12, 0 }
  0x21   :  { %v76_v15 = vand.u32 31, %v74_v14  ;;  %v538_v17 = vshrl.u32 %v74_v14, 5 }
  0x23   :  { %v77_v18 = vsub.s32 32, %v76_v15  ;;  %v79_v20 = vshll.u32 %v496_v19, %v76_v15  ;;  %v82_v22 = vshll.u32 %v497_v21, %v76_v15  ;;  %v85_v24 = vshll.u32 %v498_v23, %v76_v15 }
  0x24   :  { %v88_v26 = vshll.u32 %v499_v25, %v76_v15  ;;  %v91_v28 = vshll.u32 %v500_v27, %v76_v15  ;;  %vm94_vm1 = vcmp.lt.s32.totalorder %v538_v17, 1  ;;  %vm97_vm2 = vcmp.lt.s32.totalorder %v538_v17, 4 }
  0x25   :  { %v80_v29 = vshrl.u32 %v497_v21, %v77_v18  ;;  %v83_v30 = vshrl.u32 %v498_v23, %v77_v18  ;;  %v86_v31 = vshrl.u32 %v499_v25, %v77_v18  ;;  %v89_v32 = vshrl.u32 %v500_v27, %v77_v18 }
  0x26   :  { %v92_v34 = vshrl.u32 %v501_v33, %v77_v18  ;;  %vm96_vm3 = vcmp.lt.s32.totalorder %v538_v17, 3  ;;  %vm95_vm4 = vcmp.lt.s32.totalorder %v538_v17, 2  ;;  %v78_v55 = vshrl.u32 %v496_v19, %v77_v18 }
  0x27   :  { %v81_v36 = vor.u32 %v80_v29, %v79_v20  ;;  %v84_v37 = vor.u32 %v83_v30, %v82_v22  ;;  %v87_v38 = vor.u32 %v86_v31, %v85_v24  ;;  %v90_v39 = vor.u32 %v89_v32, %v88_v26 }
  0x28   :  { %v93_v40 = vor.u32 %v92_v34, %v91_v28 }
  0x29   :  { %v102_v41 = vsel %vm94_vm1, %v81_v36, %v84_v37  ;;  %v106_v42 = vsel %vm94_vm1, %v84_v37, %v87_v38  ;;  %v103_v43 = vsel %vm97_vm2, %v90_v39, 920167782  ;;  %v98_v4 = vsel %vm94_vm1, %v78_v55, %v81_v36 }
  0x2a   :  { %v107_v44 = vsel %vm97_vm2, %v93_v40, 1326507024  ;;  %v104_v45 = vsel %vm96_vm3, %v87_v38, %v103_v43  ;;  %v99_v6 = vsel %vm97_vm2, %v87_v38, 2102212464 }
  0x2b   :  { %v108_v46 = vsel %vm96_vm3, %v90_v39, %v107_v44  ;;  %v105_v49 = vsel %vm95_vm4, %v102_v41, %v104_v45  ;;  %v100_v19 = vsel %vm96_vm3, %v84_v37, %v99_v6 }
  0x2c   :  { %v109_v50 = vsel %vm95_vm4, %v106_v42, %v108_v46  ;;  %v135_v53 = vand.u32 65535, %v105_v49  ;;  %v136_v54 = vshrl.u32 %v105_v49, 16  ;;  %v101_v27 = vsel %vm95_vm4, %v98_v4, %v100_v19 }
  0x2d   :  { %v113_v51 = vand.u32 65535, %v109_v50  ;;  %v114_v52 = vshrl.u32 %v109_v50, 16  ;;  %v155_v31 = vmul.u32 %v541_v35, %v101_v27 }
  0x2e   :  { %v137_v59 = vmul.u32 %v135_v53, %v111_v47  ;;  %v138_v60 = vmul.u32 %v136_v54, %v111_v47  ;;  %v139_v61 = vmul.u32 %v135_v53, %v112_v48  ;;  %v140_v1 = vmul.u32 %v136_v54, %v112_v48 }
  0x2f   :  { %v115_v56 = vmul.u32 %v113_v51, %v111_v47  ;;  %v116_v57 = vmul.u32 %v114_v52, %v111_v47  ;;  %v117_v58 = vmul.u32 %v113_v51, %v112_v48  ;;  %v118_v62 = vmul.u32 %v114_v52, %v112_v48 }
  0x30   :  { %v141_v2 = vshll.u32 %v138_v60, 16  ;;  %v143_v3 = vshll.u32 %v139_v61, 16  ;;  %v142_v16 = vshrl.u32 %v138_v60, 16  ;;  %v144_v23 = vshrl.u32 %v139_v61, 16 }
  0x31   :  { %v119_v63 = vshll.u32 %v116_v57, 16  ;;  %v121_v0 = vshll.u32 %v117_v58, 16  ;;  %v120_v12 = vshrl.u32 %v116_v57, 16  ;;  %v122_v20 = vshrl.u32 %v117_v58, 16 }
  0x32   :  { %vm145_vm6 = vc.u32 %v137_v59, %v141_v2  ;;  %v147_v11 = vadd.s32 %v141_v2, %v137_v59  ;;  %v60_v2 = vld [vmem:[%s591_s2] sm:$0x1] }
  0x33   :  { %vm123_vm5 = vc.u32 %v115_v56, %v119_v63  ;;  %v125_v5 = vadd.s32 %v119_v63, %v115_v56  ;;  %v146_v14 = vsel %vm145_vm6, 1, %v502_v8  ;;  %vm61_vm14 = vcmp.gt.f32.partialorder %v60_v2, 0.5 }
  0x34   :  { %v124_v9 = vsel %vm123_vm5, 1, %v502_v8  ;;  %v148_v18 = vadd.s32 %v146_v14, %v140_v1  ;;  %vm149_vm8 = vc.u32 %v147_v11, %v143_v3  ;;  %v151_v26 = vadd.s32 %v147_v11, %v143_v3 }
  0x35   :  { %v126_v13 = vadd.s32 %v124_v9, %v118_v62  ;;  %vm127_vm7 = vc.u32 %v125_v5, %v121_v0  ;;  %v150_v22 = vsel %vm149_vm8, 1, %v502_v8  ;;  %v371_v14 = vsel %vm61_vm14, 1, %v502_v8 }
  0x36   :  { %v128_v15 = vsel %vm127_vm7, 1, %v502_v8  ;;  %v152_v24 = vadd.s32 %v150_v22, %v148_v18  ;;  %vm205_vm5 = vweird.f32 %v532_v7 }
  0x37   :  { %v130_v21 = vadd.s32 %v128_v15, %v126_v13 }
  0x38   :  { %v153_v28 = vadd.s32 %v152_v24, %v142_v16 }
  0x39   :  { %v131_v25 = vadd.s32 %v130_v21, %v120_v12 }
  0x3a   :  { %v154_v30 = vadd.s32 %v153_v28, %v144_v23 }
  0x3b   :  { %v132_v29 = vadd.s32 %v131_v25, %v122_v20  ;;  %v372_v20 = vperm.slane %v371_v14, 0 }
  0x3c   :  { %v158_v32 = vadd.s32 1, %v154_v30 }
  0x3d   :  { %vm157_vm9 = vc.u32 %v132_v29, %v151_v26  ;;  %v156_v17 = vadd.s32 %v151_v26, %v132_v29  ;;  %vm373_vm6 = vcmp.eq.s32.totalorder %v372_v20, 1 }
  0x3e   :  { %v159_v33 = vsel %vm157_vm9, %v158_v32, %v154_v30 }
  0x3f   :  { %v160_v34 = vadd.s32 %v159_v33, %v155_v31 }
  0x41   :  { %v161_v36 = vadd.s32 536870912, %v160_v34 }
  0x43   :  { %v162_v37 = vshrl.u32 %v161_v36, 30 }
  0x45   :  { %v163_v38 = vshll.u32 %v162_v37, 30  ;;  %v186_v55 = vsub.s32 4, %v162_v37 }
  0x47   :  { %v164_v39 = vsub.s32 %v160_v34, %v163_v38  ;;  %v187_v58 = vsel %vm64_vm12, %v186_v55, %v162_v37 }
  0x48   :  { %v189_v61 = vsel %vm63_vm13, 0, %v187_v58 }
  0x49   :  { %vm165_vm10 = vcmp.lt.s32.totalorder %v164_v39, 0  ;;  %v166_v40 = vsub.s32 0, %v164_v39  ;;  %v360_v3 = vadd.s32 3, %v189_v61  ;;  %v206_v9 = vand.u32 3, %v189_v61 }
  0x4b   :  { %v167_v41 = vsel %vm165_vm10, %v166_v40, %v164_v39  ;;  %v361_v11 = vand.u32 3, %v360_v3  ;;  %vm211_vm15 = vcmp.eq.s32.totalorder %v206_v9, 2  ;;  %vm207_vm1 = vcmp.lt.s32.totalorder %v206_v9, 2 }
  0x4c   :  { %v168_v42 = vclz %v167_v41  ;;  %vm208_vm2 = vcmp.eq.s32.totalorder %v206_v9, 0 }
  0x4d   :  { %vm366_vm0 = vcmp.eq.s32.totalorder %v361_v11, 2  ;;  %vm363_vm3 = vcmp.eq.s32.totalorder %v361_v11, 0  ;;  %vm362_vm4 = vcmp.lt.s32.totalorder %v361_v11, 2 }
  0x4e   :  { %v397_v43 = vadd.s32 4294967294, %v168_v42 }
  0x50   :  { %vm398_vm11 = vcmp.lt.s32.totalorder %v397_v43, 0 }
  0x51   :  { %v171_v44 = vsel %vm398_vm11, 0, %v397_v43 }
  0x52   :  { %v172_v45 = vsub.s32 32, %v171_v44  ;;  %v173_v46 = vshll.u32 %v164_v39, %v171_v44  ;;  %v176_v47 = vsub.s32 4294967266, %v171_v44 }
  0x54   :  { %v174_v35 = vshrl.u32 %v156_v17, %v172_v45  ;;  %v177_v48 = vadd.s32 127, %v176_v47 }
  0x56   :  { %v175_v49 = vor.u32 %v174_v35, %v173_v46  ;;  %v178_v50 = vshll.u32 %v177_v48, 23 }
  0x58   :  { %v179_v51 = vor.u32 4788187, %v178_v50  ;;  %v182_v52 = vcvt.s32.f32 %v175_v49 }
  0x5a   :  { %v180_v53 = vand.u32 2147483647, %v179_v51 }
  0x5c   :  { %v183_v54 = vmul.f32 %v182_v52, %v180_v53 }
  0x5e   :  { %v184_v56 = vxor.u32 2147483648, %v183_v54 }
  0x60   :  { %v185_v57 = vsel %vm64_vm12, %v184_v56, %v183_v54 }
  0x61   :  { %v188_v59 = vsel %vm63_vm13, %v532_v7, %v185_v57 }
  0x62   :  { %v190_v60 = vmul.f32 %v188_v59, %v188_v59 }
  0x64   :  { %v191_v62 = vmul.f32 -0.001358992, %v190_v60  ;;  %v198_v63 = vmul.f32 -0.00019511016, %v190_v60 }
  0x66   :  { %v192_v0 = vadd.f32 0.041655596, %v191_v62  ;;  %v199_v1 = vadd.f32 0.008332121, %v198_v63 }
  0x68   :  { %v193_v4 = vmul.f32 %v192_v0, %v190_v60  ;;  %v200_v5 = vmul.f32 %v199_v1, %v190_v60 }
  0x6a   :  { %v194_v10 = vadd.f32 -0.4999988, %v193_v4  ;;  %v201_v6 = vadd.f32 -0.16666654, %v200_v5 }
  0x6c   :  { %v195_v12 = vmul.f32 %v194_v10, %v190_v60  ;;  %v202_v13 = vmul.f32 %v201_v6, %v190_v60 }
  0x6e   :  { %v196_v15 = vadd.f32 1.0, %v195_v12  ;;  %v203_v16 = vadd.f32 1.0, %v202_v13 }
  0x70   :  { %v204_v18 = vmul.f32 %v203_v16, %v188_v59  ;;  %v212_v19 = vxor.u32 2147483648, %v196_v15 }
  0x72   :  { %v209_v21 = vxor.u32 2147483648, %v204_v18  ;;  %v213_v22 = vsel %vm211_vm15, %v212_v19, %v204_v18  ;;  %v368_v23 = vsel %vm366_vm0, %v212_v19, %v204_v18 }
  0x74   :  { %v210_v24 = vsel %vm208_vm2, %v196_v15, %v209_v21  ;;  %v365_v25 = vsel %vm363_vm3, %v196_v15, %v209_v21 }
  0x75   :  { %v214_v8 = vsel %vm207_vm1, %v210_v24, %v213_v22  ;;  %v369_v26 = vsel %vm362_vm4, %v365_v25, %v368_v23 }
  0x76   :  { %v215_v27 = vsel %vm205_vm5, nan, %v214_v8  ;;  %v370_v28 = vsel %vm205_vm5, nan, %v369_v26 }
  0x77   :  { %v374_v29 = vsel %vm373_vm6, %v215_v27, %v370_v28 }
  0x78   :  { %375 = vst [vmem:[#allocation7] sm:$0xff] %v374_v29 }
  0x79   :  { %379 = vsyncadd [#allocation4], 96  ;;  %s382_s23 = sshll.u32 %s592_s3, 4  ;;  %s503_s24 = smov [#allocation7]   ;;  %s383_s23 = int_to_ptr.hbm [resolvable:$true] %s382_s23 }
  0x7a   :  { %s380_s25 = sshll.u32 %s503_s24, 4  ;;  %s504_s26 = smov 32   ;;  %s381_s25 = int_to_ptr.vmem [resolvable:$true] %s380_s25 }
  0x7b   :  { %s505_s27 = smov 2  }
  0x7c   :  { %388 = dma.vmem_to_hbm [thread:$0]  %s381_s25, 32, %s383_s23, [#allocation4], %s504_s26, %s504_s26, %s505_s27  }
  0x7d   :  { %492 = dma.done.wait [#allocation4], 128  }
  0x7e   :  { %493 = vsyncadd [#allocation4], 4294967168 }
  0x7f   :  { %393 = vsyncpa [#allocation3], 1 }
  0x80   :  { %394 = vsyncpa [#allocation6], 1 }
  0x81   :  { %395 = vsyncpa [#allocation4], 1 }

</bundles_post_ra>
